<compile_context>
chip_gen: v6e
topology: v6e:2x2x1
jax: 0.10.0
libtpu: 0.0.40
codegen_flags: <defaults>
</compile_context>

<pallas_src>
import jax
import jax.numpy as jnp
from jax.experimental import pallas as pl
from jax.experimental.pallas import tpu as pltpu


def mlp_kernel(x_ref, w1_ref, b1_ref, w2_ref, b2_ref, w3_ref, b3_ref, out_ref):
    x = x_ref[...]

    # fc1 + ReLU
    h1 = jnp.dot(x, w1_ref[...], preferred_element_type=jnp.float32) + b1_ref[...]
    h1 = jnp.maximum(h1, 0.0)

    # fc2 + ReLU
    h2 = jnp.dot(h1, w2_ref[...], preferred_element_type=jnp.float32) + b2_ref[...]
    h2 = jnp.maximum(h2, 0.0)

    # fc3 (padded action lanes already carry a huge negative bias from the wrapper,
    # so they contribute exactly zero probability after the softmax).
    logits = jnp.dot(h2, w3_ref[...], preferred_element_type=jnp.float32) + b3_ref[...]

    # Numerically stable softmax; reciprocal on the EUP (approx) instead of a divide.
    m = jnp.max(logits, axis=-1, keepdims=True)
    e = jnp.exp(logits - m)
    denom = jnp.sum(e, axis=-1, keepdims=True)
    probs = e * pl.reciprocal(denom, approx=True)

    out_ref[...] = probs.astype(out_ref.dtype)


def _round_up(n, m):
    return ((n + m - 1) // m) * m


def _pad2(a, rows, cols, value=0.0):
    r, c = a.shape
    return jnp.pad(a, ((0, rows - r), (0, cols - c)), constant_values=value)


# Large negative but finite: exp(x - max) underflows to exactly 0 in f32,
# and max() over it never returns -inf even if every real logit were negative.
_NEG_BIG = -1e30


def mlp_forward(x, params, *, block_b=256):
    w1, b1, w2, b2, w3, b3 = params
    B, S = x.shape
    H = w1.shape[1]
    A = w3.shape[1]

    # Pad features / actions to full 128-lane tiles, batch tile to >= 8 sublanes.
    S_p = _round_up(S, 128)
    H_p = _round_up(H, 128)
    A_p = _round_up(A, 128)
    TB = min(block_b, _round_up(max(B, 8), 8))
    B_p = _round_up(B, TB)

    x_p = _pad2(x, B_p, S_p)
    w1_p = _pad2(w1, S_p, H_p)
    b1_p = _pad2(b1, 1, H_p)
    w2_p = _pad2(w2, H_p, H_p)
    b2_p = _pad2(b2, 1, H_p)
    w3_p = _pad2(w3, H_p, A_p)
    # Mask padded action lanes once, at parameter-padding time (no in-kernel mask).
    b3_p = _pad2(b3, 1, A_p, value=_NEG_BIG)

    grid = (B_p // TB,)

    # Constant block index -> weights/biases stay resident in VMEM across the grid.
    resident = lambda shape: pl.BlockSpec(shape, lambda i: (0, 0))

    out_p = pl.pallas_call(
        mlp_kernel,
        out_shape=jax.ShapeDtypeStruct((B_p, A_p), jnp.float32),
        grid=grid,
        in_specs=[
            pl.BlockSpec((TB, S_p), lambda i: (i, 0)),
            resident(w1_p.shape), resident(b1_p.shape),
            resident(w2_p.shape), resident(b2_p.shape),
            resident(w3_p.shape), resident(b3_p.shape),
        ],
        out_specs=pl.BlockSpec((TB, A_p), lambda i: (i, 0)),
        compiler_params=pltpu.CompilerParams(
            dimension_semantics=("parallel",)),
    )(x_p, w1_p, b1_p, w2_p, b2_p, w3_p, b3_p)

    return out_p[:B, :A]


def init_linear(key, fan_in, fan_out):
    # PyTorch nn.Linear default init: U(-1/sqrt(fan_in), 1/sqrt(fan_in)).
    kw, kb = jax.random.split(key)
    bound = 1.0 / jnp.sqrt(fan_in)
    # weight stored as (in, out) = W_torch.T
    w = jax.random.uniform(kw, (fan_in, fan_out), jnp.float32, -bound, bound)
    b = jax.random.uniform(kb, (1, fan_out), jnp.float32, -bound, bound)
    return w, b


def mlp_reference(x, params):
    w1, b1, w2, b2, w3, b3 = params
    h1 = jax.nn.relu(x @ w1 + b1)
    h2 = jax.nn.relu(h1 @ w2 + b2)
    return jax.nn.softmax(h2 @ w3 + b3, axis=-1)


if __name__ == "__main__":
    state_dim, action_dim, hidden_dim = 8, 4, 32

    key = jax.random.PRNGKey(0)
    kx, k1, k2, k3, kx2 = jax.random.split(key, 5)

    w1, b1 = init_linear(k1, state_dim, hidden_dim)
    w2, b2 = init_linear(k2, hidden_dim, hidden_dim)
    w3, b3 = init_linear(k3, hidden_dim, action_dim)
    params = (w1, b1, w2, b2, w3, b3)

    # Tolerance slightly looser than pure f32 because the softmax denominator uses
    # the approximate (EUP) reciprocal.
    TOL = 2e-3

    # Small batch (pads up to one 8-row tile).
    x = jax.random.normal(kx, (2, state_dim), jnp.float32)
    out = jax.block_until_ready(mlp_forward(x, params))
    ref = mlp_reference(x, params)
    assert out.shape == (2, action_dim)
    assert jnp.allclose(out, ref, atol=TOL, rtol=TOL), "mismatch vs reference (B=2)"
    assert jnp.allclose(jnp.sum(out, axis=-1), 1.0, atol=TOL), "softmax rows must sum to 1"

    # Larger ragged batch: exercises the multi-tile parallel grid + remainder padding.
    x2 = jax.random.normal(kx2, (513, state_dim), jnp.float32)
    out2 = jax.block_until_ready(mlp_forward(x2, params))
    ref2 = mlp_reference(x2, params)
    assert out2.shape == (513, action_dim)
    assert jnp.allclose(out2, ref2, atol=TOL, rtol=TOL), "mismatch vs reference (B=513)"
    assert jnp.allclose(jnp.sum(out2, axis=-1), 1.0, atol=TOL), "softmax rows must sum to 1"

    print("KERNEL_OK")
</pallas_src>

<mosaic_0001>
module attributes {stable_mosaic.version = 11 : i64} {
  func.func @mlp_kernel(%arg0: i32, %arg1: memref<8x128xf32, #tpu.memory_space<vmem>>, %arg2: memref<128x128xf32, #tpu.memory_space<vmem>>, %arg3: memref<1x128xf32, #tpu.memory_space<vmem>>, %arg4: memref<128x128xf32, #tpu.memory_space<vmem>>, %arg5: memref<1x128xf32, #tpu.memory_space<vmem>>, %arg6: memref<128x128xf32, #tpu.memory_space<vmem>>, %arg7: memref<1x128xf32, #tpu.memory_space<vmem>>, %arg8: memref<8x128xf32, #tpu.memory_space<vmem>>) attributes {dimension_semantics = [#tpu.dimension_semantics<parallel>], iteration_bounds = array<i64: 1>, scalar_prefetch = 0 : i64, scratch_operands = 0 : i64, tpu.core_type = #tpu.core_type<tc>, window_params = [{transform_indices = @transform_0, window_bounds = array<i64: 8, 128>}, {pipeline_mode = #tpu.pipeline_mode<synchronous>, transform_indices = @transform_1, window_bounds = array<i64: 128, 128>}, {pipeline_mode = #tpu.pipeline_mode<synchronous>, transform_indices = @transform_2, window_bounds = array<i64: 1, 128>}, {pipeline_mode = #tpu.pipeline_mode<synchronous>, transform_indices = @transform_3, window_bounds = array<i64: 128, 128>}, {pipeline_mode = #tpu.pipeline_mode<synchronous>, transform_indices = @transform_4, window_bounds = array<i64: 1, 128>}, {pipeline_mode = #tpu.pipeline_mode<synchronous>, transform_indices = @transform_5, window_bounds = array<i64: 128, 128>}, {pipeline_mode = #tpu.pipeline_mode<synchronous>, transform_indices = @transform_6, window_bounds = array<i64: 1, 128>}, {transform_indices = @transform_7, window_bounds = array<i64: 8, 128>}]} {
    %c0 = arith.constant 0 : index
    %c0_0 = arith.constant 0 : index
    %0 = vector.load %arg1[%c0, %c0_0] : memref<8x128xf32, #tpu.memory_space<vmem>>, vector<8x128xf32>
    %c0_1 = arith.constant 0 : index
    %c0_2 = arith.constant 0 : index
    %1 = vector.load %arg2[%c0_1, %c0_2] : memref<128x128xf32, #tpu.memory_space<vmem>>, vector<128x128xf32>
    %cst = arith.constant dense<0.000000e+00> : vector<8x128xf32>
    %2 = tpu.matmul %0, %1, %cst {dimension_numbers = #tpu.dot_dimension_numbers<[1], [0], [0], [1], [0, 0, 1, 1], [], []>} : vector<8x128xf32>, vector<128x128xf32>, vector<8x128xf32> -> vector<8x128xf32>
    %c0_3 = arith.constant 0 : index
    %c0_4 = arith.constant 0 : index
    %3 = vector.load %arg3[%c0_3, %c0_4] : memref<1x128xf32, #tpu.memory_space<vmem>>, vector<1x128xf32>
    %4 = vector.broadcast %3 : vector<1x128xf32> to vector<8x128xf32>
    %5 = arith.addf %2, %4 : vector<8x128xf32>
    %cst_5 = arith.constant 0.000000e+00 : f32
    %6 = vector.broadcast %cst_5 : f32 to vector<8x128xf32>
    %7 = arith.maximumf %5, %6 : vector<8x128xf32>
    %c0_6 = arith.constant 0 : index
    %c0_7 = arith.constant 0 : index
    %8 = vector.load %arg4[%c0_6, %c0_7] : memref<128x128xf32, #tpu.memory_space<vmem>>, vector<128x128xf32>
    %cst_8 = arith.constant dense<0.000000e+00> : vector<8x128xf32>
    %9 = tpu.matmul %7, %8, %cst_8 {dimension_numbers = #tpu.dot_dimension_numbers<[1], [0], [0], [1], [0, 0, 1, 1], [], []>} : vector<8x128xf32>, vector<128x128xf32>, vector<8x128xf32> -> vector<8x128xf32>
    %c0_9 = arith.constant 0 : index
    %c0_10 = arith.constant 0 : index
    %10 = vector.load %arg5[%c0_9, %c0_10] : memref<1x128xf32, #tpu.memory_space<vmem>>, vector<1x128xf32>
    %11 = vector.broadcast %10 : vector<1x128xf32> to vector<8x128xf32>
    %12 = arith.addf %9, %11 : vector<8x128xf32>
    %cst_11 = arith.constant 0.000000e+00 : f32
    %13 = vector.broadcast %cst_11 : f32 to vector<8x128xf32>
    %14 = arith.maximumf %12, %13 : vector<8x128xf32>
    %c0_12 = arith.constant 0 : index
    %c0_13 = arith.constant 0 : index
    %15 = vector.load %arg6[%c0_12, %c0_13] : memref<128x128xf32, #tpu.memory_space<vmem>>, vector<128x128xf32>
    %cst_14 = arith.constant dense<0.000000e+00> : vector<8x128xf32>
    %16 = tpu.matmul %14, %15, %cst_14 {dimension_numbers = #tpu.dot_dimension_numbers<[1], [0], [0], [1], [0, 0, 1, 1], [], []>} : vector<8x128xf32>, vector<128x128xf32>, vector<8x128xf32> -> vector<8x128xf32>
    %c0_15 = arith.constant 0 : index
    %c0_16 = arith.constant 0 : index
    %17 = vector.load %arg7[%c0_15, %c0_16] : memref<1x128xf32, #tpu.memory_space<vmem>>, vector<1x128xf32>
    %18 = vector.broadcast %17 : vector<1x128xf32> to vector<8x128xf32>
    %19 = arith.addf %16, %18 : vector<8x128xf32>
    %cst_17 = arith.constant dense<0xFF800000> : vector<8xf32>
    %20 = vector.multi_reduction <maximumf>, %19, %cst_17 [1] : vector<8x128xf32> to vector<8xf32>
    %21 = vector.shape_cast %20 : vector<8xf32> to vector<8x1xf32>
    %22 = vector.broadcast %21 : vector<8x1xf32> to vector<8x128xf32>
    %23 = arith.subf %19, %22 : vector<8x128xf32>
    %24 = math.exp %23 : vector<8x128xf32>
    %cst_18 = arith.constant dense<0.000000e+00> : vector<8xf32>
    %25 = vector.multi_reduction <add>, %24, %cst_18 [1] : vector<8x128xf32> to vector<8xf32>
    %26 = vector.shape_cast %25 : vector<8xf32> to vector<8x1xf32>
    %27 = tpu.reciprocal %26 {approx = true} : vector<8x1xf32> -> vector<8x1xf32>
    %28 = vector.broadcast %27 : vector<8x1xf32> to vector<8x128xf32>
    %29 = arith.mulf %24, %28 : vector<8x128xf32>
    %c0_19 = arith.constant 0 : index
    %c0_20 = arith.constant 0 : index
    %30 = vector.load %arg8[%c0_19, %c0_20] : memref<8x128xf32, #tpu.memory_space<vmem>>, vector<8x128xf32>
    tpu.vector_store %arg8[%c0_19, %c0_20], %29 {strides = array<i32>} : memref<8x128xf32, #tpu.memory_space<vmem>>, vector<8x128xf32>,
    return
  }
  func.func @transform_0(%arg0: i32) -> (i32, i32) {
    %c0_i32 = arith.constant 0 : i32
    %c0_i32_0 = arith.constant 0 : i32
    return %arg0, %c0_i32 : i32, i32
  }
  func.func @transform_1(%arg0: i32) -> (i32, i32) {
    %c0_i32 = arith.constant 0 : i32
    %c0_i32_0 = arith.constant 0 : i32
    %c0_i32_1 = arith.constant 0 : i32
    return %c0_i32, %c0_i32_0 : i32, i32
  }
  func.func @transform_2(%arg0: i32) -> (i32, i32) {
    %c0_i32 = arith.constant 0 : i32
    %c0_i32_0 = arith.constant 0 : i32
    %c0_i32_1 = arith.constant 0 : i32
    return %c0_i32, %c0_i32_0 : i32, i32
  }
  func.func @transform_3(%arg0: i32) -> (i32, i32) {
    %c0_i32 = arith.constant 0 : i32
    %c0_i32_0 = arith.constant 0 : i32
    %c0_i32_1 = arith.constant 0 : i32
    return %c0_i32, %c0_i32_0 : i32, i32
  }
  func.func @transform_4(%arg0: i32) -> (i32, i32) {
    %c0_i32 = arith.constant 0 : i32
    %c0_i32_0 = arith.constant 0 : i32
    %c0_i32_1 = arith.constant 0 : i32
    return %c0_i32, %c0_i32_0 : i32, i32
  }
  func.func @transform_5(%arg0: i32) -> (i32, i32) {
    %c0_i32 = arith.constant 0 : i32
    %c0_i32_0 = arith.constant 0 : i32
    %c0_i32_1 = arith.constant 0 : i32
    return %c0_i32, %c0_i32_0 : i32, i32
  }
  func.func @transform_6(%arg0: i32) -> (i32, i32) {
    %c0_i32 = arith.constant 0 : i32
    %c0_i32_0 = arith.constant 0 : i32
    %c0_i32_1 = arith.constant 0 : i32
    return %c0_i32, %c0_i32_0 : i32, i32
  }
  func.func @transform_7(%arg0: i32) -> (i32, i32) {
    %c0_i32 = arith.constant 0 : i32
    %c0_i32_0 = arith.constant 0 : i32
    return %arg0, %c0_i32 : i32, i32
  }
}

</mosaic_0001>

<bundles_post_ra>
// kernel: tpu_custom_call.1
= control target key start
LH: loop header
LB: loop body
LE: loop exit
PB: predicated region body
PF: predicated region fallthrough
CT: control target
= control target key end

     0   :  { %12 = vsyncpa [#allocation3], 0  ;;  %s805_s0 = inlined_call_operand.hbm [shape: f32[8,128], index: 0, kind: input, shape index: {}]   ;;  %s806_s1 = inlined_call_operand.hbm [shape: f32[128,128], index: 1, kind: input, shape index: {}]   ;;  %s807_s2 = inlined_call_operand.vmem [shape: f32[1,128], index: 2, kind: input, shape index: {}]   ;;  %s808_s3 = inlined_call_operand.hbm [shape: f32[128,128], index: 3, kind: input, shape index: {}]   ;;  %s809_s4 = inlined_call_operand.vmem [shape: f32[1,128], index: 4, kind: input, shape index: {}]   ;;  %s810_s5 = inlined_call_operand.hbm [shape: f32[128,128], index: 5, kind: input, shape index: {}]   ;;  %s811_s6 = inlined_call_operand.vmem [shape: f32[1,128], index: 6, kind: input, shape index: {}]   ;;  %s812_s7 = inlined_call_operand.hbm [shape: f32[8,128], index: 7, kind: output, shape index: {}]  }
   0x1   :  { %13 = vsyncpa [#allocation6], 0 }
   0x2   :  { %14 = vsyncpa [#allocation9], 0 }
   0x3   :  { %15 = vsyncpa [#allocation4], 0  ;;  %s669_s24 = smov [#allocation5]  }
   0x4   :  { %s31_s25 = sshll.u32 %s669_s24, 4  ;;  %s32_s25 = int_to_ptr.vmem [resolvable:$true] %s31_s25 }
   0x5   :  { %s569_s26 = scalar_lea.vmem %s32_s25, 2048  ;;  %p574_p1 = scmp.lt.s32.totalorder %s32_s25, %s32_s25 }
   0x6   :  { %p570_p0 = scmp.ne.s32.totalorder %s32_s25, %s569_s26  ;;  %p575_p2 = scmp.lt.s32.totalorder %s569_s26, %s569_s26 }
   0x8   :  { %p576_p3 = por %p575_p2, %p574_p1 }
   0xa   :  { %p577_p4 = pnand %p576_p3, %p570_p0 }
   0xc   :  { %580 = shalt.err (!%p577_p4)
}
   0xd   :  { %s670_s27 = smov 128   ;;  %s671_s28 = smov 8  }
   0xe   :  { %37 = dma.hbm_to_vmem [thread:$0]  %s806_s1, 2048, %s32_s25, [#allocation6], %s670_s27, %s670_s27, %s671_s28  }
   0xf   :  { %s672_s8 = smov [#allocation2]   ;;  %s673_s10 = smov [#allocation7]  }
  0x10   :  { %s22_s9 = sshll.u32 %s672_s8, 4  ;;  %s45_s11 = sshll.u32 %s673_s10, 4  ;;  %s23_s9 = int_to_ptr.vmem [resolvable:$true] %s22_s9  ;;  %s46_s11 = int_to_ptr.vmem [resolvable:$true] %s45_s11 }
  0x11   :  { %s589_s12 = scalar_lea.vmem %s23_s9, 128  ;;  %p594_p6 = scmp.lt.s32.totalorder %s23_s9, %s23_s9 }
  0x12   :  { %p590_p5 = scmp.ne.s32.totalorder %s23_s9, %s589_s12  ;;  %p595_p7 = scmp.lt.s32.totalorder %s589_s12, %s589_s12 }
  0x14   :  { %p596_p8 = por %p595_p7, %p594_p6 }
  0x16   :  { %p597_p9 = pnand %p596_p8, %p590_p5 }
  0x18   :  { %600 = shalt.err (!%p597_p9)
}
  0x19   :  { %25 = dma.hbm_to_vmem [thread:$0]  %s805_s0, 128, %s23_s9, [#allocation3]  }
  0x1a   :  { %s609_s15 = scalar_lea.vmem %s46_s11, 2048  ;;  %p614_p11 = scmp.lt.s32.totalorder %s46_s11, %s46_s11 }
  0x1b   :  { %p610_p10 = scmp.ne.s32.totalorder %s46_s11, %s609_s15  ;;  %p615_p12 = scmp.lt.s32.totalorder %s609_s15, %s609_s15 }
  0x1d   :  { %p616_p13 = por %p615_p12, %p614_p11 }
  0x1f   :  { %p617_p0 = pnand %p616_p13, %p610_p10 }
  0x21   :  { %620 = shalt.err (!%p617_p0)
}
  0x22   :  { %51 = dma.hbm_to_vmem [thread:$0]  %s808_s3, 2048, %s46_s11, [#allocation6], %s670_s27, %s670_s27, %s671_s28  }
  0x23   :  { %s674_s17 = smov [#allocation8]  }
  0x24   :  { %s59_s18 = sshll.u32 %s674_s17, 4  ;;  %s60_s18 = int_to_ptr.vmem [resolvable:$true] %s59_s18 }
  0x25   :  { %s629_s19 = scalar_lea.vmem %s60_s18, 2048  ;;  %p634_p2 = scmp.lt.s32.totalorder %s60_s18, %s60_s18 }
  0x26   :  { %p630_p1 = scmp.ne.s32.totalorder %s60_s18, %s629_s19  ;;  %p635_p3 = scmp.lt.s32.totalorder %s629_s19, %s629_s19 }
  0x28   :  { %p636_p4 = por %p635_p3, %p634_p2 }
  0x2a   :  { %p637_p5 = pnand %p636_p4, %p630_p1 }
  0x2c   :  { %640 = shalt.err (!%p637_p5)
}
  0x2d   :  { %65 = dma.hbm_to_vmem [thread:$0]  %s810_s5, 2048, %s60_s18, [#allocation9], %s670_s27, %s670_s27, %s671_s28  }
  0x2e   :  { %661 = dma.done.wait [#allocation3], 128  }
  0x2f   :  { %662 = vsyncadd [#allocation3], 4294967168 }
  0x30   :  { %663 = dma.done.wait [#allocation6], 4096  }
  0x31   :  { %664 = vsyncadd [#allocation6], 4294963200 }
  0x32   :  { %665 = dma.done.wait [#allocation9], 2048  }
  0x33   :  { %666 = vsyncadd [#allocation9], 4294965248  ;;  %v675_v0 = vmov 0.0   ;;  %vm676_vm0 = vmmov 0   ;;  %v96_v1 = vld [vmem:[#allocation5 + $0x78] sm:$0xff]  ;;  %v95_v2 = vld [vmem:[#allocation5 + $0x70] sm:$0xff] }
  0x34   :  { %443 = vmatprep.subr.mxu0 %v675_v0  ;;  %475 = vmatprep.mubr.msk.f32.mxu0 %vm676_vm0, %v675_v0  ;;  %v94_v3 = vld [vmem:[#allocation5 + $0x68] sm:$0xff]  ;;  %v93_v4 = vld [vmem:[#allocation5 + $0x60] sm:$0xff]  ;;  %v190_v5 = vld [vmem:[#allocation7 + $0x78] sm:$0xff] }
  0x35   :  { %478 = vmatprep.subr.mxu1 %v675_v0  ;;  %510 = vmatprep.mubr.msk.f32.mxu1 %vm676_vm0, %v675_v0  ;;  %v92_v6 = vld [vmem:[#allocation5 + $0x58] sm:$0xff]  ;;  %v189_v7 = vld [vmem:[#allocation7 + $0x70] sm:$0xff]  ;;  %v188_v8 = vld [vmem:[#allocation7 + $0x68] sm:$0xff] }
  0x36   :  { %444 = vmatpush3.msra.mxu0 %v96_v1  ;;  %479 = vmatpush3.msra.mxu1 %v190_v5  ;;  %v91_v9 = vld [vmem:[#allocation5 + $0x50] sm:$0xff]  ;;  %v187_v10 = vld [vmem:[#allocation7 + $0x60] sm:$0xff]  ;;  %v90_v11 = vld [vmem:[#allocation5 + $0x48] sm:$0xff] }
  0x37   :  { %445 = vmatprep.subr.mxu0 %v675_v0  ;;  %480 = vmatprep.subr.mxu1 %v675_v0  ;;  %v186_v12 = vld [vmem:[#allocation7 + $0x58] sm:$0xff]  ;;  %v89_v13 = vld [vmem:[#allocation5 + $0x40] sm:$0xff]  ;;  %v185_v14 = vld [vmem:[#allocation7 + $0x50] sm:$0xff] }
  0x38   :  { %446 = vmatpush3.msra.mxu0 %v95_v2  ;;  %481 = vmatpush3.msra.mxu1 %v189_v7  ;;  %v88_v15 = vld [vmem:[#allocation5 + $0x38] sm:$0xff]  ;;  %v184_v16 = vld [vmem:[#allocation7 + $0x48] sm:$0xff]  ;;  %v87_v17 = vld [vmem:[#allocation5 + $0x30] sm:$0xff] }
  0x39   :  { %447 = vmatprep.subr.mxu0 %v675_v0  ;;  %482 = vmatprep.subr.mxu1 %v675_v0  ;;  %v183_v18 = vld [vmem:[#allocation7 + $0x40] sm:$0xff]  ;;  %v86_v19 = vld [vmem:[#allocation5 + $0x28] sm:$0xff]  ;;  %v182_v20 = vld [vmem:[#allocation7 + $0x38] sm:$0xff] }
  0x3a   :  { %448 = vmatpush3.msra.mxu0 %v94_v3  ;;  %483 = vmatpush3.msra.mxu1 %v188_v8  ;;  %v85_v21 = vld [vmem:[#allocation5 + $0x20] sm:$0xff]  ;;  %v181_v22 = vld [vmem:[#allocation7 + $0x30] sm:$0xff]  ;;  %v84_v23 = vld [vmem:[#allocation5 + $0x18] sm:$0xff] }
  0x3b   :  { %449 = vmatprep.subr.mxu0 %v675_v0  ;;  %484 = vmatprep.subr.mxu1 %v675_v0  ;;  %v180_v24 = vld [vmem:[#allocation7 + $0x28] sm:$0xff]  ;;  %v83_v25 = vld [vmem:[#allocation5 + $0x10] sm:$0xff]  ;;  %v179_v26 = vld [vmem:[#allocation7 + $0x20] sm:$0xff] }
  0x3c   :  { %450 = vmatpush3.msra.mxu0 %v93_v4  ;;  %485 = vmatpush3.msra.mxu1 %v187_v10  ;;  %v82_v27 = vld [vmem:[#allocation5 + $0x8] sm:$0xff]  ;;  %v178_v28 = vld [vmem:[#allocation7 + $0x18] sm:$0xff]  ;;  %v81_v29 = vld [vmem:[#allocation5] sm:$0xff] }
  0x3d   :  { %451 = vmatprep.subr.mxu0 %v675_v0  ;;  %486 = vmatprep.subr.mxu1 %v675_v0  ;;  %v80_v30 = vld [vmem:[#allocation2] sm:$0xff]  ;;  %v177_v31 = vld [vmem:[#allocation7 + $0x10] sm:$0xff]  ;;  %v176_v32 = vld [vmem:[#allocation7 + $0x8] sm:$0xff] }
  0x3e   :  { %452 = vmatpush3.msra.mxu0 %v92_v6  ;;  %487 = vmatpush3.msra.mxu1 %v186_v12  ;;  %v175_v33 = vld [vmem:[#allocation7] sm:$0xff]  ;;  %v284_v34 = vld [vmem:[#allocation8 + $0x78] sm:$0xff]  ;;  %v283_v35 = vld [vmem:[#allocation8 + $0x70] sm:$0xff] }
  0x3f   :  { %453 = vmatprep.subr.mxu0 %v675_v0  ;;  %488 = vmatprep.subr.mxu1 %v675_v0  ;;  %v282_v36 = vld [vmem:[#allocation8 + $0x68] sm:$0xff]  ;;  %v281_v37 = vld [vmem:[#allocation8 + $0x60] sm:$0xff]  ;;  %v280_v38 = vld [vmem:[#allocation8 + $0x58] sm:$0xff] }
  0x40   :  { %454 = vmatpush3.msra.mxu0 %v91_v9  ;;  %489 = vmatpush3.msra.mxu1 %v185_v14  ;;  %v279_v39 = vld [vmem:[#allocation8 + $0x50] sm:$0xff]  ;;  %v278_v40 = vld [vmem:[#allocation8 + $0x48] sm:$0xff]  ;;  %v277_v41 = vld [vmem:[#allocation8 + $0x40] sm:$0xff] }
  0x41   :  { %455 = vmatprep.subr.mxu0 %v675_v0  ;;  %490 = vmatprep.subr.mxu1 %v675_v0  ;;  %v276_v42 = vld [vmem:[#allocation8 + $0x38] sm:$0xff]  ;;  %v275_v43 = vld [vmem:[#allocation8 + $0x30] sm:$0xff]  ;;  %v274_v44 = vld [vmem:[#allocation8 + $0x28] sm:$0xff] }
  0x42   :  { %456 = vmatpush3.msra.mxu0 %v90_v11  ;;  %491 = vmatpush3.msra.mxu1 %v184_v16  ;;  %v273_v45 = vld [vmem:[#allocation8 + $0x20] sm:$0xff]  ;;  %v272_v46 = vld [vmem:[#allocation8 + $0x18] sm:$0xff]  ;;  %v271_v52 = vld [vmem:[#allocation8 + $0x10] sm:$0xff] }
  0x43   :  { %457 = vmatprep.subr.mxu0 %v675_v0  ;;  %492 = vmatprep.subr.mxu1 %v675_v0  ;;  %v389_v47 = vld [vmem:[%s807_s2] ss:$0 sm:$0xff]  ;;  %v270_v53 = vld [vmem:[#allocation8 + $0x8] sm:$0xff]  ;;  %v269_v54 = vld [vmem:[#allocation8] sm:$0xff] }
  0x44   :  { %458 = vmatpush3.msra.mxu0 %v89_v13  ;;  %493 = vmatpush3.msra.mxu1 %v183_v18  ;;  %v390_v55 = vld [vmem:[%s809_s4] ss:$0 sm:$0xff]  ;;  %s677_s4 = smov [#allocation10]  }
  0x45   :  { %459 = vmatprep.subr.mxu0 %v675_v0  ;;  %494 = vmatprep.subr.mxu1 %v675_v0  ;;  %v391_v60 = vld [vmem:[%s811_s6] ss:$0 sm:$0xff]  ;;  %s378_s24 = sshll.u32 %s677_s4, 4  ;;  %s379_s24 = int_to_ptr.vmem [resolvable:$true] %s378_s24 }
  0x46   :  { %460 = vmatpush3.msra.mxu0 %v88_v15  ;;  %495 = vmatpush3.msra.mxu1 %v182_v20  ;;  %s641_s25 = scalar_lea.vmem %s379_s24, 128  ;;  %p646_p7 = scmp.lt.s32.totalorder %s379_s24, %s379_s24 }
  0x47   :  { %461 = vmatprep.subr.mxu0 %v675_v0  ;;  %496 = vmatprep.subr.mxu1 %v675_v0  ;;  %p642_p6 = scmp.ne.s32.totalorder %s379_s24, %s641_s25  ;;  %p647_p8 = scmp.lt.s32.totalorder %s641_s25, %s641_s25 }
  0x48   :  { %462 = vmatpush3.msra.mxu0 %v87_v17  ;;  %497 = vmatpush3.msra.mxu1 %v181_v22 }
  0x49   :  { %463 = vmatprep.subr.mxu0 %v675_v0  ;;  %498 = vmatprep.subr.mxu1 %v675_v0  ;;  %p648_p9 = por %p647_p8, %p646_p7 }
  0x4a   :  { %464 = vmatpush3.msra.mxu0 %v86_v19  ;;  %499 = vmatpush3.msra.mxu1 %v180_v24 }
  0x4b   :  { %465 = vmatprep.subr.mxu0 %v675_v0  ;;  %500 = vmatprep.subr.mxu1 %v675_v0  ;;  %p649_p10 = pnand %p648_p9, %p642_p6 }
  0x4c   :  { %466 = vmatpush3.msra.mxu0 %v85_v21  ;;  %501 = vmatpush3.msra.mxu1 %v179_v26 }
  0x4d   :  { %467 = vmatprep.subr.mxu0 %v675_v0  ;;  %502 = vmatprep.subr.mxu1 %v675_v0 }
  0x4e   :  { %468 = vmatpush3.msra.mxu0 %v84_v23  ;;  %503 = vmatpush3.msra.mxu1 %v178_v28 }
  0x4f   :  { %469 = vmatprep.subr.mxu0 %v675_v0  ;;  %504 = vmatprep.subr.mxu1 %v675_v0 }
  0x50   :  { %470 = vmatpush3.msra.mxu0 %v83_v25  ;;  %505 = vmatpush3.msra.mxu1 %v177_v31 }
  0x51   :  { %471 = vmatprep.subr.mxu0 %v675_v0  ;;  %506 = vmatprep.subr.mxu1 %v675_v0 }
  0x52   :  { %472 = vmatpush3.msra.mxu0 %v82_v27  ;;  %507 = vmatpush3.msra.mxu1 %v176_v32 }
  0x53   :  { %473 = vmatprep.subr.mxu0 %v675_v0  ;;  %508 = vmatprep.subr.mxu1 %v675_v0 }
  0x54   :  { %474 = vmatpush3.msra.mxu0 %v81_v29  ;;  %509 = vmatpush3.msra.mxu1 %v175_v33 }
  0x55   :  { %476 = vmatmul.mubr.f32.vlgmr.msra.gmra.mxu0 %v80_v30  ;;  %513 = vmatprep.subr.mxu0 %v675_v0 }
  0x56   :  { %545 = vmatprep.mubr.msk.f32.mxu0 %vm676_vm0, %v675_v0  ;;  %514 = vmatpush3.msra.mxu0 %v284_v34 }
  0x57   :  { %515 = vmatprep.subr.mxu0 %v675_v0 }
  0x58   :  { %516 = vmatpush3.msra.mxu0 %v283_v35 }
  0x59   :  { %517 = vmatprep.subr.mxu0 %v675_v0 }
  0x5a   :  { %518 = vmatpush3.msra.mxu0 %v282_v36 }
  0x5b   :  { %519 = vmatprep.subr.mxu0 %v675_v0 }
  0x5c   :  { %520 = vmatpush3.msra.mxu0 %v281_v37 }
  0x5d   :  { %521 = vmatprep.subr.mxu0 %v675_v0 }
  0x5e   :  { %522 = vmatpush3.msra.mxu0 %v280_v38 }
  0x5f   :  { %523 = vmatprep.subr.mxu0 %v675_v0 }
  0x60   :  { %524 = vmatpush3.msra.mxu0 %v279_v39 }
  0x61   :  { %525 = vmatprep.subr.mxu0 %v675_v0 }
  0x62   :  { %526 = vmatpush3.msra.mxu0 %v278_v40 }
  0x63   :  { %527 = vmatprep.subr.mxu0 %v675_v0 }
  0x64   :  { %528 = vmatpush3.msra.mxu0 %v277_v41 }
  0x65   :  { %529 = vmatprep.subr.mxu0 %v675_v0 }
  0x66   :  { %530 = vmatpush3.msra.mxu0 %v276_v42 }
  0x67   :  { %531 = vmatprep.subr.mxu0 %v675_v0 }
  0x68   :  { %532 = vmatpush3.msra.mxu0 %v275_v43 }
  0x69   :  { %533 = vmatprep.subr.mxu0 %v675_v0 }
  0x6a   :  { %534 = vmatpush3.msra.mxu0 %v274_v44 }
  0x6b   :  { %535 = vmatprep.subr.mxu0 %v675_v0 }
  0x6c   :  { %536 = vmatpush3.msra.mxu0 %v273_v45 }
  0x6d   :  { %537 = vmatprep.subr.mxu0 %v675_v0 }
  0x6e   :  { %538 = vmatpush3.msra.mxu0 %v272_v46 }
  0x6f   :  { %539 = vmatprep.subr.mxu0 %v675_v0 }
  0x70   :  { %540 = vmatpush3.msra.mxu0 %v271_v52 }
  0x71   :  { %541 = vmatprep.subr.mxu0 %v675_v0 }
  0x72   :  { %542 = vmatpush3.msra.mxu0 %v270_v53 }
  0x73   :  { %543 = vmatprep.subr.mxu0 %v675_v0 }
  0x74   :  { %544 = vmatpush3.msra.mxu0 %v269_v54 }
 0x115   :  { %v170_v48 = vpop.f32.mrf.mxu0 }
 0x116   :  { %v171_v49 = vadd.f32 %v389_v47, %v170_v48 }
 0x117   :  { %v477_v50 = vpop.f32.mrf.mxu0 }
 0x118   :  { %v174_v51 = vmax.f32 %v171_v49, 0.0 }
 0x11a   :  { %511 = vmatmul.mubr.f32.vlgmr.msra.gmra.mxu1 %v174_v51 }
 0x1da   :  { %v264_v56 = vpop.f32.mrf.mxu1 }
 0x1db   :  { %v265_v57 = vadd.f32 %v390_v55, %v264_v56 }
 0x1dc   :  { %v512_v58 = vpop.f32.mrf.mxu1 }
 0x1dd   :  { %v268_v59 = vmax.f32 %v265_v57, 0.0 }
 0x1df   :  { %546 = vmatmul.mubr.f32.vlgmr.msra.gmra.mxu0 %v268_v59 }
 0x29f   :  { %v358_v61 = vpop.f32.mrf.mxu0 }
 0x2a0   :  { %v359_v62 = vadd.f32 %v391_v60, %v358_v61 }
 0x2a1   :  { %v547_v63 = vpop.f32.mrf.mxu0 }
 0x2a2   :  { %362 = vmax.xlane.f32.xlu0 %v359_v62 }
 0x32b   :  { %v363_v0 = vpop.xlane.xlu0 %362 }
 0x32c   :  { %v364_v1 = vsub.f32 %v359_v62, %v363_v0 }
 0x32e   :  { %v365_v2 = vmul.f32 1.442695, %v364_v1 }
 0x330   :  { %557 = vpow2.f32 %v365_v2 }
 0x33d   :  { %v558_v3 = vpop.eup %557 }
 0x33e   :  { %367 = vadd.xlane.f32.xlu0 %v558_v3 }
 0x3c7   :  { %v368_v4 = vpop.xlane.xlu0 %367 }
 0x3c8   :  { %559 = vrcp.f32 %v368_v4 }
 0x3d5   :  { %v560_v5 = vpop.eup %559 }
 0x3d6   :  { %v370_v6 = vmul.f32 %v560_v5, %v558_v3 }
 0x3d8   :  { %371 = vst [vmem:[#allocation10] sm:$0xff] %v370_v6 }
 0x3d9   :  { %652 = shalt.err (!%p649_p10)
}
 0x3da   :  { %381 = dma.vmem_to_hbm [thread:$0]  %s379_s24, 128, %s812_s7, [#allocation4]  }
 0x3db   :  { %667 = dma.done.wait [#allocation4], 128  }
 0x3dc   :  { %668 = vsyncadd [#allocation4], 4294967168 }
 0x3dd   :  { %385 = vsyncpa [#allocation3], 1 }
 0x3de   :  { %386 = vsyncpa [#allocation6], 1 }
 0x3df   :  { %387 = vsyncpa [#allocation9], 1 }
 0x3e0   :  { %388 = vsyncpa [#allocation4], 1 }

</bundles_post_ra>
